<compile_context>
chip_gen: v7x
topology: tpu7x:2x2x1
jax: 0.10.0
libtpu: 0.0.40
codegen_flags: <defaults>
</compile_context>

<pallas_src>
import functools

import jax
import jax.numpy as jnp
from jax.experimental import pallas as pl
from jax.experimental.pallas import tpu as pltpu


def _round_up(x: int, m: int) -> int:
    return ((x + m - 1) // m) * m


def _xgea_tile_kernel(lc_ref, rc_ref, pcol_ref, prow_ref, out_ref, *,
                      n_valid: int, tj_sub: int):
    """One (TI, TJ_OUTER) super-tile of the pairwise-L1 hinge loss."""
    n_chunks, ti, d_chunk = lc_ref.shape
    tj_outer = rc_ref.shape[2]
    n_sub = tj_outer // tj_sub
    bi = pl.program_id(0)
    bj = pl.program_id(1)

    # Output block is resident across the j (reduction) axis: zero it once.
    @pl.when(bj == 0)
    def _init():
        out_ref[...] = jnp.zeros_like(out_ref)

    big = jnp.float32(1e30)
    pcol = pcol_ref[...].astype(jnp.float32)                       # (TI, 1)
    row_ids = (bi * ti
               + jax.lax.broadcasted_iota(jnp.int32, (ti, tj_sub), 0))
    row_pad = row_ids >= n_valid                                   # hoisted

    def accum_chunk(lch, rch, dist_c):
        # lch: (TI, DC) in the compute dtype; rch: (DC, TJ_SUB).
        # D-reduction folded into VPU accumulation on the lane-dense tile.
        # TODO(synk): if bundle dumps show the per-d lane broadcast landing on
        # the VALU slot, offload it to the idle MXU (rank-1 dot with ones row).
        for dd in range(d_chunk):
            dist_c = dist_c + jnp.abs(
                lch[:, dd:dd + 1] - rch[dd:dd + 1, :]).astype(jnp.float32)
        return dist_c

    col_acc = jnp.zeros((1, tj_sub), jnp.float32)
    for js in range(n_sub):                 # static sweep over 128-lane tiles
        j0 = js * tj_sub
        col_ids = (bj * tj_outer + j0
                   + jax.lax.broadcasted_iota(jnp.int32, (ti, tj_sub), 1))
        # Seed the f32 accumulator with +BIG on the diagonal and on padded
        # rows/cols: the hinge collapses to 0 there, so no masks are needed
        # and no diagonal correction constant exists (gamma may be traced).
        invalid = (row_ids == col_ids) | row_pad | (col_ids >= n_valid)
        dist = jnp.where(invalid, big, jnp.float32(0.0))           # (TI, TJS)

        if n_chunks == 1:
            dist = accum_chunk(lc_ref[0], rc_ref[0, :, j0:j0 + tj_sub], dist)
        else:
            def d_body(c, dist_c):
                return accum_chunk(lc_ref[c], rc_ref[c, :, j0:j0 + tj_sub],
                                   dist_c)
            dist = jax.lax.fori_loop(0, n_chunks, d_body, dist)

        prow = prow_ref[:, j0:j0 + tj_sub].astype(jnp.float32)     # (1, TJS)
        hinge = (jnp.maximum(pcol - dist, 0.0)
                 + jnp.maximum(prow - dist, 0.0))
        # Sublane-only reduce (XLU slot, off the VALU critical path).
        col_acc = col_acc + jnp.sum(hinge, axis=0, keepdims=True)

    out_ref[...] = out_ref[...] + col_acc.reshape(out_ref.shape)


def xgea_loss(pairs: jnp.ndarray, features: jnp.ndarray, gamma=1.0):
    """pairs: (N, 2) int32 indices into features; features: (E, D) float."""
    # TODO(synk): the gather + pad + transpose is O(N*D) XLA glue next to the
    # O(N^2*D) tile work; it could move in-kernel via scalar-prefetched `pairs`
    # + manual DMA to save one HBM round trip on the (N, D) slabs.
    left = jnp.take(features, pairs[:, 0], axis=0)        # (N, D)
    right = jnp.take(features, pairs[:, 1], axis=0)       # (N, D)
    n, d = left.shape
    compute_dtype = features.dtype     # bf16 features -> bf16 VALU inner loop
                                       # on v6e/v7x; keep f32 on v5e.

    # Positives pos_i = ||l_i - r_i||_1 : tiny O(N*D) precompute, gamma folded.
    pos = jnp.sum(jnp.abs(left.astype(jnp.float32)
                          - right.astype(jnp.float32)), axis=1)    # (N,) f32

    # i (sublane) tiling: gi >= 2 whenever N > 8 so v7x megacore gets both
    # TensorCores busy; TI capped at 128 to keep the dist accumulator at 16
    # vregs and out of spill territory.
    ti = min(128, _round_up(-(-n // 2), 8))
    n_pi = _round_up(n, ti)
    gi = n_pi // ti
    # j (lane) tiling: wide 512-lane blocks amortize per-grid-step overhead;
    # swept 128 lanes at a time in-kernel.
    tj_sub = 128
    tj_outer = min(512, _round_up(n, tj_sub))
    n_pj = _round_up(n, tj_outer)
    gj = n_pj // tj_outer
    # d tiling: full unroll for small D; chunks of 32 on a leading array dim
    # swept by an in-kernel fori_loop for large D (bounded code size).
    d_chunk = d if d <= 64 else 32
    d_pad = _round_up(d, d_chunk)
    n_chunks = d_pad // d_chunk

    left_p = jnp.pad(left, ((0, n_pi - n), (0, d_pad - d))).astype(compute_dtype)
    right_p = jnp.pad(right, ((0, n_pj - n), (0, d_pad - d))).astype(compute_dtype)
    lc = left_p.reshape(n_pi, n_chunks, d_chunk).transpose(1, 0, 2)   # (C,Npi,DC)
    rc = right_p.T.reshape(n_chunks, d_chunk, n_pj)                   # (C,DC,Npj)
    pcol = jnp.pad(gamma + pos, (0, n_pi - n)).reshape(n_pi, 1).astype(jnp.float32)
    prow = jnp.pad(gamma + pos, (0, n_pj - n)).reshape(1, n_pj).astype(jnp.float32)

    kernel = functools.partial(_xgea_tile_kernel, n_valid=n, tj_sub=tj_sub)
    partials = pl.pallas_call(
        kernel,
        grid=(gi, gj),
        in_specs=[
            pl.BlockSpec((n_chunks, ti, d_chunk), lambda i, j: (0, i, 0)),
            pl.BlockSpec((n_chunks, d_chunk, tj_outer), lambda i, j: (0, 0, j)),
            pl.BlockSpec((ti, 1), lambda i, j: (i, 0)),
            pl.BlockSpec((1, tj_outer), lambda i, j: (0, j)),
        ],
        out_specs=pl.BlockSpec((1, 1, tj_sub), lambda i, j: (i, 0, 0)),
        out_shape=jax.ShapeDtypeStruct((gi, 1, tj_sub), jnp.float32),
        compiler_params=pltpu.CompilerParams(
            dimension_semantics=("parallel", "arbitrary")),
    )(lc, rc, pcol, prow)

    total = jnp.sum(partials)
    denom = 2.0 * n * max(n - 1, 1)          # guard N == 1 (empty negative set)
    return total / denom


def _xgea_loss_ref(pairs, features, gamma=1.0):
    l = features[pairs[:, 0]].astype(jnp.float32)
    r = features[pairs[:, 1]].astype(jnp.float32)
    n = l.shape[0]
    dist = jnp.sum(jnp.abs(l[:, None, :] - r[None, :, :]), axis=-1)
    pos = jnp.diagonal(dist)
    mask = 1.0 - jnp.eye(n, dtype=jnp.float32)
    lr = jnp.maximum(gamma + pos[:, None] - dist, 0.0) * mask
    rl = jnp.maximum(gamma + pos[None, :] - dist, 0.0) * mask
    return (jnp.sum(lr) + jnp.sum(rl)) / (2.0 * n * (n - 1))


if __name__ == "__main__":
    key = jax.random.PRNGKey(0)
    gamma = 1.0
    k0, k1, k2 = jax.random.split(key, 3)

    # Small demo consistent with the module: 16 entities, hidden 32, 8 pairs.
    E, D, N = 16, 32, 8
    features = jax.random.normal(k0, (E, D), dtype=jnp.float32)
    pairs = jnp.stack([jnp.arange(N, dtype=jnp.int32),
                       jnp.arange(N, dtype=jnp.int32) + N], axis=1)
    loss = xgea_loss(pairs, features, gamma=gamma)
    jax.block_until_ready(loss)
    ref = _xgea_loss_ref(pairs, features, gamma=gamma)
    assert jnp.allclose(loss, ref, rtol=1e-4, atol=1e-5), (loss, ref)

    # Larger checks: multi-block grid (megacore i axis), padding, the
    # chunked-D fori_loop path, and accumulation across j grid steps.
    for (E2, D2, N2), kk in (((700, 72, 300), k1), ((1400, 24, 600), k2)):
        feats2 = jax.random.normal(kk, (E2, D2), dtype=jnp.float32)
        idx = jnp.arange(N2, dtype=jnp.int32)
        pairs2 = jnp.stack([idx, idx + N2], axis=1)
        loss2 = xgea_loss(pairs2, feats2, gamma=gamma)
        jax.block_until_ready(loss2)
        ref2 = _xgea_loss_ref(pairs2, feats2, gamma=gamma)
        assert jnp.allclose(loss2, ref2, rtol=1e-4, atol=1e-5), (loss2, ref2)

    print("KERNEL_OK")
</pallas_src>

<mosaic_0001>
module attributes {stable_mosaic.version = 11 : i64} {
  func.func @_xgea_tile_kernel(%arg0: i32, %arg1: i32, %arg2: memref<1x8x32xf32, #tpu.memory_space<vmem>>, %arg3: memref<1x32x128xf32, #tpu.memory_space<vmem>>, %arg4: memref<8x1xf32, #tpu.memory_space<vmem>>, %arg5: memref<1x128xf32, #tpu.memory_space<vmem>>, %arg6: memref<1x1x128xf32, #tpu.memory_space<vmem>>) attributes {dimension_semantics = [#tpu.dimension_semantics<parallel>, #tpu.dimension_semantics<arbitrary>], iteration_bounds = array<i64: 1, 1>, scalar_prefetch = 0 : i64, scratch_operands = 0 : i64, tpu.core_type = #tpu.core_type<tc>, window_params = [{transform_indices = @transform_0, window_bounds = array<i64: 1, 8, 32>}, {transform_indices = @transform_1, window_bounds = array<i64: 1, 32, 128>}, {transform_indices = @transform_2, window_bounds = array<i64: 8, 1>}, {transform_indices = @transform_3, window_bounds = array<i64: 1, 128>}, {transform_indices = @transform_4, window_bounds = array<i64: 1, 1, 128>}]} {
    %c0_i32 = arith.constant 0 : i32
    %0 = arith.cmpi eq, %arg1, %c0_i32 : i32
    %1 = arith.extui %0 : i1 to i32
    %c0_i32_0 = arith.constant 0 : i32
    %2 = arith.cmpi ne, %1, %c0_i32_0 : i32
    scf.if %2 {
      %cst_24 = arith.constant 0.000000e+00 : f32
      %269 = vector.broadcast %cst_24 : f32 to vector<1x1x128xf32>
      %c0_25 = arith.constant 0 : index
      %c0_26 = arith.constant 0 : index
      %c0_27 = arith.constant 0 : index
      %270 = vector.load %arg6[%c0_25, %c0_26, %c0_27] : memref<1x1x128xf32, #tpu.memory_space<vmem>>, vector<1x1x128xf32>
      tpu.vector_store %arg6[%c0_25, %c0_26, %c0_27], %269 {strides = array<i32>} : memref<1x1x128xf32, #tpu.memory_space<vmem>>, vector<1x1x128xf32>,
    } else {
    }
    %c0 = arith.constant 0 : index
    %c0_1 = arith.constant 0 : index
    %3 = vector.load %arg4[%c0, %c0_1] : memref<8x1xf32, #tpu.memory_space<vmem>>, vector<8x1xf32>
    %c8_i32 = arith.constant 8 : i32
    %4 = arith.muli %arg0, %c8_i32 : i32
    %5 = tpu.iota {dimensions = array<i32: 0>} : vector<8x128xi32>
    %6 = vector.broadcast %4 : i32 to vector<8x128xi32>
    %7 = arith.addi %6, %5 : vector<8x128xi32>
    %c8_i32_2 = arith.constant 8 : i32
    %8 = vector.broadcast %c8_i32_2 : i32 to vector<8x128xi32>
    %9 = arith.cmpi sge, %7, %8 : vector<8x128xi32>
    %cst = arith.constant 0.000000e+00 : f32
    %10 = vector.broadcast %cst : f32 to vector<1x128xf32>
    %c128_i32 = arith.constant 128 : i32
    %11 = arith.muli %arg1, %c128_i32 : i32
    %c0_i32_3 = arith.constant 0 : i32
    %12 = arith.addi %11, %c0_i32_3 : i32
    %13 = tpu.iota {dimensions = array<i32: 1>} : vector<8x128xi32>
    %14 = vector.broadcast %12 : i32 to vector<8x128xi32>
    %15 = arith.addi %14, %13 : vector<8x128xi32>
    %16 = arith.cmpi eq, %7, %15 : vector<8x128xi32>
    %17 = arith.ori %16, %9 : vector<8x128xi1>
    %c8_i32_4 = arith.constant 8 : i32
    %18 = vector.broadcast %c8_i32_4 : i32 to vector<8x128xi32>
    %19 = arith.cmpi sge, %15, %18 : vector<8x128xi32>
    %20 = arith.ori %17, %19 : vector<8x128xi1>
    %cst_5 = arith.constant 1.000000e+30 : f32
    %cst_6 = arith.constant 0.000000e+00 : f32
    %21 = vector.broadcast %cst_5 : f32 to vector<8x128xf32>
    %22 = vector.broadcast %cst_6 : f32 to vector<8x128xf32>
    %23 = arith.select %20, %21, %22 : vector<8x128xi1>, vector<8x128xf32>
    %c0_7 = arith.constant 0 : index
    %c0_8 = arith.constant 0 : index
    %c0_9 = arith.constant 0 : index
    %24 = vector.load %arg2[%c0_7, %c0_8, %c0_9] : memref<1x8x32xf32, #tpu.memory_space<vmem>>, vector<1x8x32xf32>
    %25 = vector.shape_cast %24 : vector<1x8x32xf32> to vector<8x32xf32>
    %c0_10 = arith.constant 0 : index
    %c0_11 = arith.constant 0 : index
    %c0_12 = arith.constant 0 : index
    %26 = vector.load %arg3[%c0_10, %c0_11, %c0_12] : memref<1x32x128xf32, #tpu.memory_space<vmem>>, vector<1x32x128xf32>
    %27 = vector.shape_cast %26 : vector<1x32x128xf32> to vector<32x128xf32>
    %28 = vector.extract_strided_slice %25 {offsets = [0, 0], sizes = [8, 1], strides = [1, 1]} : vector<8x32xf32> to vector<8x1xf32>
    %29 = vector.extract_strided_slice %27 {offsets = [0, 0], sizes = [1, 128], strides = [1, 1]} : vector<32x128xf32> to vector<1x128xf32>
    %30 = vector.broadcast %28 : vector<8x1xf32> to vector<8x128xf32>
    %31 = vector.broadcast %29 : vector<1x128xf32> to vector<8x128xf32>
    %32 = arith.subf %30, %31 : vector<8x128xf32>
    %33 = math.absf %32 : vector<8x128xf32>
    %34 = arith.addf %23, %33 : vector<8x128xf32>
    %35 = vector.extract_strided_slice %25 {offsets = [0, 1], sizes = [8, 1], strides = [1, 1]} : vector<8x32xf32> to vector<8x1xf32>
    %36 = vector.extract_strided_slice %27 {offsets = [1, 0], sizes = [1, 128], strides = [1, 1]} : vector<32x128xf32> to vector<1x128xf32>
    %37 = vector.broadcast %35 : vector<8x1xf32> to vector<8x128xf32>
    %38 = vector.broadcast %36 : vector<1x128xf32> to vector<8x128xf32>
    %39 = arith.subf %37, %38 : vector<8x128xf32>
    %40 = math.absf %39 : vector<8x128xf32>
    %41 = arith.addf %34, %40 : vector<8x128xf32>
    %42 = vector.extract_strided_slice %25 {offsets = [0, 2], sizes = [8, 1], strides = [1, 1]} : vector<8x32xf32> to vector<8x1xf32>
    %43 = vector.extract_strided_slice %27 {offsets = [2, 0], sizes = [1, 128], strides = [1, 1]} : vector<32x128xf32> to vector<1x128xf32>
    %44 = vector.broadcast %42 : vector<8x1xf32> to vector<8x128xf32>
    %45 = vector.broadcast %43 : vector<1x128xf32> to vector<8x128xf32>
    %46 = arith.subf %44, %45 : vector<8x128xf32>
    %47 = math.absf %46 : vector<8x128xf32>
    %48 = arith.addf %41, %47 : vector<8x128xf32>
    %49 = vector.extract_strided_slice %25 {offsets = [0, 3], sizes = [8, 1], strides = [1, 1]} : vector<8x32xf32> to vector<8x1xf32>
    %50 = vector.extract_strided_slice %27 {offsets = [3, 0], sizes = [1, 128], strides = [1, 1]} : vector<32x128xf32> to vector<1x128xf32>
    %51 = vector.broadcast %49 : vector<8x1xf32> to vector<8x128xf32>
    %52 = vector.broadcast %50 : vector<1x128xf32> to vector<8x128xf32>
    %53 = arith.subf %51, %52 : vector<8x128xf32>
    %54 = math.absf %53 : vector<8x128xf32>
    %55 = arith.addf %48, %54 : vector<8x128xf32>
    %56 = vector.extract_strided_slice %25 {offsets = [0, 4], sizes = [8, 1], strides = [1, 1]} : vector<8x32xf32> to vector<8x1xf32>
    %57 = vector.extract_strided_slice %27 {offsets = [4, 0], sizes = [1, 128], strides = [1, 1]} : vector<32x128xf32> to vector<1x128xf32>
    %58 = vector.broadcast %56 : vector<8x1xf32> to vector<8x128xf32>
    %59 = vector.broadcast %57 : vector<1x128xf32> to vector<8x128xf32>
    %60 = arith.subf %58, %59 : vector<8x128xf32>
    %61 = math.absf %60 : vector<8x128xf32>
    %62 = arith.addf %55, %61 : vector<8x128xf32>
    %63 = vector.extract_strided_slice %25 {offsets = [0, 5], sizes = [8, 1], strides = [1, 1]} : vector<8x32xf32> to vector<8x1xf32>
    %64 = vector.extract_strided_slice %27 {offsets = [5, 0], sizes = [1, 128], strides = [1, 1]} : vector<32x128xf32> to vector<1x128xf32>
    %65 = vector.broadcast %63 : vector<8x1xf32> to vector<8x128xf32>
    %66 = vector.broadcast %64 : vector<1x128xf32> to vector<8x128xf32>
    %67 = arith.subf %65, %66 : vector<8x128xf32>
    %68 = math.absf %67 : vector<8x128xf32>
    %69 = arith.addf %62, %68 : vector<8x128xf32>
    %70 = vector.extract_strided_slice %25 {offsets = [0, 6], sizes = [8, 1], strides = [1, 1]} : vector<8x32xf32> to vector<8x1xf32>
    %71 = vector.extract_strided_slice %27 {offsets = [6, 0], sizes = [1, 128], strides = [1, 1]} : vector<32x128xf32> to vector<1x128xf32>
    %72 = vector.broadcast %70 : vector<8x1xf32> to vector<8x128xf32>
    %73 = vector.broadcast %71 : vector<1x128xf32> to vector<8x128xf32>
    %74 = arith.subf %72, %73 : vector<8x128xf32>
    %75 = math.absf %74 : vector<8x128xf32>
    %76 = arith.addf %69, %75 : vector<8x128xf32>
    %77 = vector.extract_strided_slice %25 {offsets = [0, 7], sizes = [8, 1], strides = [1, 1]} : vector<8x32xf32> to vector<8x1xf32>
    %78 = vector.extract_strided_slice %27 {offsets = [7, 0], sizes = [1, 128], strides = [1, 1]} : vector<32x128xf32> to vector<1x128xf32>
    %79 = vector.broadcast %77 : vector<8x1xf32> to vector<8x128xf32>
    %80 = vector.broadcast %78 : vector<1x128xf32> to vector<8x128xf32>
    %81 = arith.subf %79, %80 : vector<8x128xf32>
    %82 = math.absf %81 : vector<8x128xf32>
    %83 = arith.addf %76, %82 : vector<8x128xf32>
    %84 = vector.extract_strided_slice %25 {offsets = [0, 8], sizes = [8, 1], strides = [1, 1]} : vector<8x32xf32> to vector<8x1xf32>
    %85 = vector.extract_strided_slice %27 {offsets = [8, 0], sizes = [1, 128], strides = [1, 1]} : vector<32x128xf32> to vector<1x128xf32>
    %86 = vector.broadcast %84 : vector<8x1xf32> to vector<8x128xf32>
    %87 = vector.broadcast %85 : vector<1x128xf32> to vector<8x128xf32>
    %88 = arith.subf %86, %87 : vector<8x128xf32>
    %89 = math.absf %88 : vector<8x128xf32>
    %90 = arith.addf %83, %89 : vector<8x128xf32>
    %91 = vector.extract_strided_slice %25 {offsets = [0, 9], sizes = [8, 1], strides = [1, 1]} : vector<8x32xf32> to vector<8x1xf32>
    %92 = vector.extract_strided_slice %27 {offsets = [9, 0], sizes = [1, 128], strides = [1, 1]} : vector<32x128xf32> to vector<1x128xf32>
    %93 = vector.broadcast %91 : vector<8x1xf32> to vector<8x128xf32>
    %94 = vector.broadcast %92 : vector<1x128xf32> to vector<8x128xf32>
    %95 = arith.subf %93, %94 : vector<8x128xf32>
    %96 = math.absf %95 : vector<8x128xf32>
    %97 = arith.addf %90, %96 : vector<8x128xf32>
    %98 = vector.extract_strided_slice %25 {offsets = [0, 10], sizes = [8, 1], strides = [1, 1]} : vector<8x32xf32> to vector<8x1xf32>
    %99 = vector.extract_strided_slice %27 {offsets = [10, 0], sizes = [1, 128], strides = [1, 1]} : vector<32x128xf32> to vector<1x128xf32>
    %100 = vector.broadcast %98 : vector<8x1xf32> to vector<8x128xf32>
    %101 = vector.broadcast %99 : vector<1x128xf32> to vector<8x128xf32>
    %102 = arith.subf %100, %101 : vector<8x128xf32>
    %103 = math.absf %102 : vector<8x128xf32>
    %104 = arith.addf %97, %103 : vector<8x128xf32>
    %105 = vector.extract_strided_slice %25 {offsets = [0, 11], sizes = [8, 1], strides = [1, 1]} : vector<8x32xf32> to vector<8x1xf32>
    %106 = vector.extract_strided_slice %27 {offsets = [11, 0], sizes = [1, 128], strides = [1, 1]} : vector<32x128xf32> to vector<1x128xf32>
    %107 = vector.broadcast %105 : vector<8x1xf32> to vector<8x128xf32>
    %108 = vector.broadcast %106 : vector<1x128xf32> to vector<8x128xf32>
    %109 = arith.subf %107, %108 : vector<8x128xf32>
    %110 = math.absf %109 : vector<8x128xf32>
    %111 = arith.addf %104, %110 : vector<8x128xf32>
    %112 = vector.extract_strided_slice %25 {offsets = [0, 12], sizes = [8, 1], strides = [1, 1]} : vector<8x32xf32> to vector<8x1xf32>
    %113 = vector.extract_strided_slice %27 {offsets = [12, 0], sizes = [1, 128], strides = [1, 1]} : vector<32x128xf32> to vector<1x128xf32>
    %114 = vector.broadcast %112 : vector<8x1xf32> to vector<8x128xf32>
    %115 = vector.broadcast %113 : vector<1x128xf32> to vector<8x128xf32>
    %116 = arith.subf %114, %115 : vector<8x128xf32>
    %117 = math.absf %116 : vector<8x128xf32>
    %118 = arith.addf %111, %117 : vector<8x128xf32>
    %119 = vector.extract_strided_slice %25 {offsets = [0, 13], sizes = [8, 1], strides = [1, 1]} : vector<8x32xf32> to vector<8x1xf32>
    %120 = vector.extract_strided_slice %27 {offsets = [13, 0], sizes = [1, 128], strides = [1, 1]} : vector<32x128xf32> to vector<1x128xf32>
    %121 = vector.broadcast %119 : vector<8x1xf32> to vector<8x128xf32>
    %122 = vector.broadcast %120 : vector<1x128xf32> to vector<8x128xf32>
    %123 = arith.subf %121, %122 : vector<8x128xf32>
    %124 = math.absf %123 : vector<8x128xf32>
    %125 = arith.addf %118, %124 : vector<8x128xf32>
    %126 = vector.extract_strided_slice %25 {offsets = [0, 14], sizes = [8, 1], strides = [1, 1]} : vector<8x32xf32> to vector<8x1xf32>
    %127 = vector.extract_strided_slice %27 {offsets = [14, 0], sizes = [1, 128], strides = [1, 1]} : vector<32x128xf32> to vector<1x128xf32>
    %128 = vector.broadcast %126 : vector<8x1xf32> to vector<8x128xf32>
    %129 = vector.broadcast %127 : vector<1x128xf32> to vector<8x128xf32>
    %130 = arith.subf %128, %129 : vector<8x128xf32>
    %131 = math.absf %130 : vector<8x128xf32>
    %132 = arith.addf %125, %131 : vector<8x128xf32>
    %133 = vector.extract_strided_slice %25 {offsets = [0, 15], sizes = [8, 1], strides = [1, 1]} : vector<8x32xf32> to vector<8x1xf32>
    %134 = vector.extract_strided_slice %27 {offsets = [15, 0], sizes = [1, 128], strides = [1, 1]} : vector<32x128xf32> to vector<1x128xf32>
    %135 = vector.broadcast %133 : vector<8x1xf32> to vector<8x128xf32>
    %136 = vector.broadcast %134 : vector<1x128xf32> to vector<8x128xf32>
    %137 = arith.subf %135, %136 : vector<8x128xf32>
    %138 = math.absf %137 : vector<8x128xf32>
    %139 = arith.addf %132, %138 : vector<8x128xf32>
    %140 = vector.extract_strided_slice %25 {offsets = [0, 16], sizes = [8, 1], strides = [1, 1]} : vector<8x32xf32> to vector<8x1xf32>
    %141 = vector.extract_strided_slice %27 {offsets = [16, 0], sizes = [1, 128], strides = [1, 1]} : vector<32x128xf32> to vector<1x128xf32>
    %142 = vector.broadcast %140 : vector<8x1xf32> to vector<8x128xf32>
    %143 = vector.broadcast %141 : vector<1x128xf32> to vector<8x128xf32>
    %144 = arith.subf %142, %143 : vector<8x128xf32>
    %145 = math.absf %144 : vector<8x128xf32>
    %146 = arith.addf %139, %145 : vector<8x128xf32>
    %147 = vector.extract_strided_slice %25 {offsets = [0, 17], sizes = [8, 1], strides = [1, 1]} : vector<8x32xf32> to vector<8x1xf32>
    %148 = vector.extract_strided_slice %27 {offsets = [17, 0], sizes = [1, 128], strides = [1, 1]} : vector<32x128xf32> to vector<1x128xf32>
    %149 = vector.broadcast %147 : vector<8x1xf32> to vector<8x128xf32>
    %150 = vector.broadcast %148 : vector<1x128xf32> to vector<8x128xf32>
    %151 = arith.subf %149, %150 : vector<8x128xf32>
    %152 = math.absf %151 : vector<8x128xf32>
    %153 = arith.addf %146, %152 : vector<8x128xf32>
    %154 = vector.extract_strided_slice %25 {offsets = [0, 18], sizes = [8, 1], strides = [1, 1]} : vector<8x32xf32> to vector<8x1xf32>
    %155 = vector.extract_strided_slice %27 {offsets = [18, 0], sizes = [1, 128], strides = [1, 1]} : vector<32x128xf32> to vector<1x128xf32>
    %156 = vector.broadcast %154 : vector<8x1xf32> to vector<8x128xf32>
    %157 = vector.broadcast %155 : vector<1x128xf32> to vector<8x128xf32>
    %158 = arith.subf %156, %157 : vector<8x128xf32>
    %159 = math.absf %158 : vector<8x128xf32>
    %160 = arith.addf %153, %159 : vector<8x128xf32>
    %161 = vector.extract_strided_slice %25 {offsets = [0, 19], sizes = [8, 1], strides = [1, 1]} : vector<8x32xf32> to vector<8x1xf32>
    %162 = vector.extract_strided_slice %27 {offsets = [19, 0], sizes = [1, 128], strides = [1, 1]} : vector<32x128xf32> to vector<1x128xf32>
    %163 = vector.broadcast %161 : vector<8x1xf32> to vector<8x128xf32>
    %164 = vector.broadcast %162 : vector<1x128xf32> to vector<8x128xf32>
    %165 = arith.subf %163, %164 : vector<8x128xf32>
    %166 = math.absf %165 : vector<8x128xf32>
    %167 = arith.addf %160, %166 : vector<8x128xf32>
    %168 = vector.extract_strided_slice %25 {offsets = [0, 20], sizes = [8, 1], strides = [1, 1]} : vector<8x32xf32> to vector<8x1xf32>
    %169 = vector.extract_strided_slice %27 {offsets = [20, 0], sizes = [1, 128], strides = [1, 1]} : vector<32x128xf32> to vector<1x128xf32>
    %170 = vector.broadcast %168 : vector<8x1xf32> to vector<8x128xf32>
    %171 = vector.broadcast %169 : vector<1x128xf32> to vector<8x128xf32>
    %172 = arith.subf %170, %171 : vector<8x128xf32>
    %173 = math.absf %172 : vector<8x128xf32>
    %174 = arith.addf %167, %173 : vector<8x128xf32>
    %175 = vector.extract_strided_slice %25 {offsets = [0, 21], sizes = [8, 1], strides = [1, 1]} : vector<8x32xf32> to vector<8x1xf32>
    %176 = vector.extract_strided_slice %27 {offsets = [21, 0], sizes = [1, 128], strides = [1, 1]} : vector<32x128xf32> to vector<1x128xf32>
    %177 = vector.broadcast %175 : vector<8x1xf32> to vector<8x128xf32>
    %178 = vector.broadcast %176 : vector<1x128xf32> to vector<8x128xf32>
    %179 = arith.subf %177, %178 : vector<8x128xf32>
    %180 = math.absf %179 : vector<8x128xf32>
    %181 = arith.addf %174, %180 : vector<8x128xf32>
    %182 = vector.extract_strided_slice %25 {offsets = [0, 22], sizes = [8, 1], strides = [1, 1]} : vector<8x32xf32> to vector<8x1xf32>
    %183 = vector.extract_strided_slice %27 {offsets = [22, 0], sizes = [1, 128], strides = [1, 1]} : vector<32x128xf32> to vector<1x128xf32>
    %184 = vector.broadcast %182 : vector<8x1xf32> to vector<8x128xf32>
    %185 = vector.broadcast %183 : vector<1x128xf32> to vector<8x128xf32>
    %186 = arith.subf %184, %185 : vector<8x128xf32>
    %187 = math.absf %186 : vector<8x128xf32>
    %188 = arith.addf %181, %187 : vector<8x128xf32>
    %189 = vector.extract_strided_slice %25 {offsets = [0, 23], sizes = [8, 1], strides = [1, 1]} : vector<8x32xf32> to vector<8x1xf32>
    %190 = vector.extract_strided_slice %27 {offsets = [23, 0], sizes = [1, 128], strides = [1, 1]} : vector<32x128xf32> to vector<1x128xf32>
    %191 = vector.broadcast %189 : vector<8x1xf32> to vector<8x128xf32>
    %192 = vector.broadcast %190 : vector<1x128xf32> to vector<8x128xf32>
    %193 = arith.subf %191, %192 : vector<8x128xf32>
    %194 = math.absf %193 : vector<8x128xf32>
    %195 = arith.addf %188, %194 : vector<8x128xf32>
    %196 = vector.extract_strided_slice %25 {offsets = [0, 24], sizes = [8, 1], strides = [1, 1]} : vector<8x32xf32> to vector<8x1xf32>
    %197 = vector.extract_strided_slice %27 {offsets = [24, 0], sizes = [1, 128], strides = [1, 1]} : vector<32x128xf32> to vector<1x128xf32>
    %198 = vector.broadcast %196 : vector<8x1xf32> to vector<8x128xf32>
    %199 = vector.broadcast %197 : vector<1x128xf32> to vector<8x128xf32>
    %200 = arith.subf %198, %199 : vector<8x128xf32>
    %201 = math.absf %200 : vector<8x128xf32>
    %202 = arith.addf %195, %201 : vector<8x128xf32>
    %203 = vector.extract_strided_slice %25 {offsets = [0, 25], sizes = [8, 1], strides = [1, 1]} : vector<8x32xf32> to vector<8x1xf32>
    %204 = vector.extract_strided_slice %27 {offsets = [25, 0], sizes = [1, 128], strides = [1, 1]} : vector<32x128xf32> to vector<1x128xf32>
    %205 = vector.broadcast %203 : vector<8x1xf32> to vector<8x128xf32>
    %206 = vector.broadcast %204 : vector<1x128xf32> to vector<8x128xf32>
    %207 = arith.subf %205, %206 : vector<8x128xf32>
    %208 = math.absf %207 : vector<8x128xf32>
    %209 = arith.addf %202, %208 : vector<8x128xf32>
    %210 = vector.extract_strided_slice %25 {offsets = [0, 26], sizes = [8, 1], strides = [1, 1]} : vector<8x32xf32> to vector<8x1xf32>
    %211 = vector.extract_strided_slice %27 {offsets = [26, 0], sizes = [1, 128], strides = [1, 1]} : vector<32x128xf32> to vector<1x128xf32>
    %212 = vector.broadcast %210 : vector<8x1xf32> to vector<8x128xf32>
    %213 = vector.broadcast %211 : vector<1x128xf32> to vector<8x128xf32>
    %214 = arith.subf %212, %213 : vector<8x128xf32>
    %215 = math.absf %214 : vector<8x128xf32>
    %216 = arith.addf %209, %215 : vector<8x128xf32>
    %217 = vector.extract_strided_slice %25 {offsets = [0, 27], sizes = [8, 1], strides = [1, 1]} : vector<8x32xf32> to vector<8x1xf32>
    %218 = vector.extract_strided_slice %27 {offsets = [27, 0], sizes = [1, 128], strides = [1, 1]} : vector<32x128xf32> to vector<1x128xf32>
    %219 = vector.broadcast %217 : vector<8x1xf32> to vector<8x128xf32>
    %220 = vector.broadcast %218 : vector<1x128xf32> to vector<8x128xf32>
    %221 = arith.subf %219, %220 : vector<8x128xf32>
    %222 = math.absf %221 : vector<8x128xf32>
    %223 = arith.addf %216, %222 : vector<8x128xf32>
    %224 = vector.extract_strided_slice %25 {offsets = [0, 28], sizes = [8, 1], strides = [1, 1]} : vector<8x32xf32> to vector<8x1xf32>
    %225 = vector.extract_strided_slice %27 {offsets = [28, 0], sizes = [1, 128], strides = [1, 1]} : vector<32x128xf32> to vector<1x128xf32>
    %226 = vector.broadcast %224 : vector<8x1xf32> to vector<8x128xf32>
    %227 = vector.broadcast %225 : vector<1x128xf32> to vector<8x128xf32>
    %228 = arith.subf %226, %227 : vector<8x128xf32>
    %229 = math.absf %228 : vector<8x128xf32>
    %230 = arith.addf %223, %229 : vector<8x128xf32>
    %231 = vector.extract_strided_slice %25 {offsets = [0, 29], sizes = [8, 1], strides = [1, 1]} : vector<8x32xf32> to vector<8x1xf32>
    %232 = vector.extract_strided_slice %27 {offsets = [29, 0], sizes = [1, 128], strides = [1, 1]} : vector<32x128xf32> to vector<1x128xf32>
    %233 = vector.broadcast %231 : vector<8x1xf32> to vector<8x128xf32>
    %234 = vector.broadcast %232 : vector<1x128xf32> to vector<8x128xf32>
    %235 = arith.subf %233, %234 : vector<8x128xf32>
    %236 = math.absf %235 : vector<8x128xf32>
    %237 = arith.addf %230, %236 : vector<8x128xf32>
    %238 = vector.extract_strided_slice %25 {offsets = [0, 30], sizes = [8, 1], strides = [1, 1]} : vector<8x32xf32> to vector<8x1xf32>
    %239 = vector.extract_strided_slice %27 {offsets = [30, 0], sizes = [1, 128], strides = [1, 1]} : vector<32x128xf32> to vector<1x128xf32>
    %240 = vector.broadcast %238 : vector<8x1xf32> to vector<8x128xf32>
    %241 = vector.broadcast %239 : vector<1x128xf32> to vector<8x128xf32>
    %242 = arith.subf %240, %241 : vector<8x128xf32>
    %243 = math.absf %242 : vector<8x128xf32>
    %244 = arith.addf %237, %243 : vector<8x128xf32>
    %245 = vector.extract_strided_slice %25 {offsets = [0, 31], sizes = [8, 1], strides = [1, 1]} : vector<8x32xf32> to vector<8x1xf32>
    %246 = vector.extract_strided_slice %27 {offsets = [31, 0], sizes = [1, 128], strides = [1, 1]} : vector<32x128xf32> to vector<1x128xf32>
    %247 = vector.broadcast %245 : vector<8x1xf32> to vector<8x128xf32>
    %248 = vector.broadcast %246 : vector<1x128xf32> to vector<8x128xf32>
    %249 = arith.subf %247, %248 : vector<8x128xf32>
    %250 = math.absf %249 : vector<8x128xf32>
    %251 = arith.addf %244, %250 : vector<8x128xf32>
    %c0_13 = arith.constant 0 : index
    %c0_14 = arith.constant 0 : index
    %252 = vector.load %arg5[%c0_13, %c0_14] : memref<1x128xf32, #tpu.memory_space<vmem>>, vector<1x128xf32>
    %253 = vector.broadcast %3 : vector<8x1xf32> to vector<8x128xf32>
    %254 = arith.subf %253, %251 : vector<8x128xf32>
    %cst_15 = arith.constant 0.000000e+00 : f32
    %255 = vector.broadcast %cst_15 : f32 to vector<8x128xf32>
    %256 = arith.maximumf %254, %255 : vector<8x128xf32>
    %257 = vector.broadcast %252 : vector<1x128xf32> to vector<8x128xf32>
    %258 = arith.subf %257, %251 : vector<8x128xf32>
    %cst_16 = arith.constant 0.000000e+00 : f32
    %259 = vector.broadcast %cst_16 : f32 to vector<8x128xf32>
    %260 = arith.maximumf %258, %259 : vector<8x128xf32>
    %261 = arith.addf %256, %260 : vector<8x128xf32>
    %cst_17 = arith.constant dense<0.000000e+00> : vector<128xf32>
    %262 = vector.multi_reduction <add>, %261, %cst_17 [0] : vector<8x128xf32> to vector<128xf32>
    %263 = vector.shape_cast %262 : vector<128xf32> to vector<1x128xf32>
    %264 = arith.addf %10, %263 : vector<1x128xf32>
    %c0_18 = arith.constant 0 : index
    %c0_19 = arith.constant 0 : index
    %c0_20 = arith.constant 0 : index
    %265 = vector.load %arg6[%c0_18, %c0_19, %c0_20] : memref<1x1x128xf32, #tpu.memory_space<vmem>>, vector<1x1x128xf32>
    %266 = vector.shape_cast %264 : vector<1x128xf32> to vector<1x1x128xf32>
    %267 = arith.addf %265, %266 : vector<1x1x128xf32>
    %c0_21 = arith.constant 0 : index
    %c0_22 = arith.constant 0 : index
    %c0_23 = arith.constant 0 : index
    %268 = vector.load %arg6[%c0_21, %c0_22, %c0_23] : memref<1x1x128xf32, #tpu.memory_space<vmem>>, vector<1x1x128xf32>
    tpu.vector_store %arg6[%c0_21, %c0_22, %c0_23], %267 {strides = array<i32>} : memref<1x1x128xf32, #tpu.memory_space<vmem>>, vector<1x1x128xf32>,
    return
  }
  func.func @transform_0(%arg0: i32, %arg1: i32) -> (i32, i32, i32) {
    %c0_i32 = arith.constant 0 : i32
    %c0_i32_0 = arith.constant 0 : i32
    %c0_i32_1 = arith.constant 0 : i32
    return %c0_i32, %arg0, %c0_i32_0 : i32, i32, i32
  }
  func.func @transform_1(%arg0: i32, %arg1: i32) -> (i32, i32, i32) {
    %c0_i32 = arith.constant 0 : i32
    %c0_i32_0 = arith.constant 0 : i32
    %c0_i32_1 = arith.constant 0 : i32
    return %c0_i32, %c0_i32_0, %arg1 : i32, i32, i32
  }
  func.func @transform_2(%arg0: i32, %arg1: i32) -> (i32, i32) {
    %c0_i32 = arith.constant 0 : i32
    %c0_i32_0 = arith.constant 0 : i32
    return %arg0, %c0_i32 : i32, i32
  }
  func.func @transform_3(%arg0: i32, %arg1: i32) -> (i32, i32) {
    %c0_i32 = arith.constant 0 : i32
    %c0_i32_0 = arith.constant 0 : i32
    return %c0_i32, %arg1 : i32, i32
  }
  func.func @transform_4(%arg0: i32, %arg1: i32) -> (i32, i32, i32) {
    %c0_i32 = arith.constant 0 : i32
    %c0_i32_0 = arith.constant 0 : i32
    %c0_i32_1 = arith.constant 0 : i32
    return %arg0, %c0_i32, %c0_i32_0 : i32, i32, i32
  }
}

</mosaic_0001>

<bundles_post_ra>
// kernel: tpu_custom_call.1
= control target key start
LH: loop header
LB: loop body
LE: loop exit
PB: predicated region body
PF: predicated region fallthrough
CT: control target
= control target key end

     0   :  { %9 = vsyncpa [#allocation3], 0  ;;  %s754_s0 = inlined_call_operand.vmem [shape: f32[1,8,32], index: 0, kind: input, shape index: {}]   ;;  %s755_s1 = inlined_call_operand.hbm [shape: f32[1,32,128], index: 1, kind: input, shape index: {}]   ;;  %s756_s2 = inlined_call_operand.vmem [shape: f32[8,1], index: 2, kind: input, shape index: {}]   ;;  %s757_s3 = inlined_call_operand.vmem [shape: f32[1,128], index: 3, kind: input, shape index: {}]   ;;  %s758_s4 = inlined_call_operand.hbm [shape: f32[1,1,128], index: 4, kind: output, shape index: {}]  }
   0x1   :  { %10 = vsyncpa [#allocation4], 0  ;;  %s573_s15 = smov [#allocation2]   ;;  %s525_s19 = scalar_lea.hbm %s755_s1, 512 }
   0x2   :  { %s18_s16 = sshll.u32 %s573_s15, 4  ;;  %p526_p0 = scmp.ne.s32.totalorder %s755_s1, %s525_s19  ;;  %s19_s16 = int_to_ptr.vmem [resolvable:$true] %s18_s16 }
   0x3   :  { %p529_p1 = scmp.lt.u32.totalorder %s525_s19, %s755_s1 }
   0x5   :  { %p531_p2 = pnand %p529_p1, %p526_p0 }
   0x7   :  { %534 = shalt.err (!%p531_p2)
}
   0x8   :  { %s535_s24 = scalar_lea.vmem %s19_s16, 512  ;;  %p540_p4 = scmp.lt.s32.totalorder %s19_s16, %s19_s16 }
   0x9   :  { %p536_p3 = scmp.ne.s32.totalorder %s19_s16, %s535_s24  ;;  %p541_p5 = scmp.lt.s32.totalorder %s535_s24, %s535_s24 }
   0xb   :  { %p542_p6 = por %p541_p5, %p540_p4 }
   0xd   :  { %p543_p7 = pnand %p542_p6, %p536_p3 }
   0xf   :  { %546 = shalt.err (!%p543_p7)
}
  0x10   :  { %s574_s25 = smov 128   ;;  %s575_s26 = smov 8  }
  0x11   :  { %24 = dma.hbm_to_vmem [thread:$0]  %s755_s1, 512, %s19_s16, [#allocation3], %s574_s25, %s574_s25, %s575_s26  }
  0x12   :  { %569 = dma.done.wait [#allocation3], 512  }
  0x13   :  { %570 = vsyncadd [#allocation3], 4294966784  ;;  %v576_v0 = vmov 2   ;;  %v577_v1 = vmov 0   ;;  %v651_v2 = vld [vmem:[%s754_s0] sm:$0xff]  ;;  %v578_v3 = vmov 0.0   ;;  %v39_v35 = vlaneseq }
  0x14   :  { %494 = vset.pattern.permute.xlu1 %v576_v0  ;;  %492 = vset.pattern.permute.xlu0 %v577_v1  ;;  %36 = vst [vmem:[#allocation5] sm:$0x1] %v578_v3  ;;  %v579_v4 = vmov 3   ;;  %v580_v5 = vmov 1   ;;  %v581_v6 = vmov 4   ;;  %v582_v7 = vmov 5  }
  0x15   :  { %83 = vperm.xlu1 %494, %v651_v2   ;;  %61 = vperm.xlu0 %492, %v651_v2   ;;  %v583_v8 = vmov 6   ;;  %v584_v9 = vmov 8   ;;  %v585_v10 = vmov 7   ;;  %v586_v11 = vmov 11   ;;  %v37_v24 = vld [vmem:[%s756_s2] sm:$0xff]  ;;  %s609_s6 = smov [#allocation5]  }
  0x16   :  { %v587_v12 = vmov 9   ;;  %v588_v13 = vmov 14   ;;  %v589_v14 = vmov 10   ;;  %v590_v15 = vmov 17   ;;  %v55_v39 = vld [vmem:[#allocation2] sm:$0xff]  ;;  %s445_s7 = sshll.u32 %s609_s6, 4  ;;  %s446_s7 = int_to_ptr.vmem [resolvable:$true] %s445_s7 }
  0x17   :  { %v591_v16 = vmov 12   ;;  %v592_v17 = vmov 20   ;;  %v593_v18 = vmov 13   ;;  %v594_v19 = vmov 23   ;;  %s551_s8 = scalar_lea.vmem %s446_s7, 32  ;;  %p552_p9 = scmp.lt.s32.totalorder %s446_s7, %s446_s7 }
  0x18   :  { %v595_v20 = vmov 15   ;;  %v596_v21 = vmov 26   ;;  %v597_v22 = vmov 16   ;;  %v598_v23 = vmov 29  }
  0x19   :  { %495 = vset.pattern.permute.xlu1 %v579_v4  ;;  %493 = vset.pattern.permute.xlu0 %v580_v5  ;;  %v599_v25 = vmov 18   ;;  %v600_v26 = vmov 19   ;;  %v601_v27 = vmov 21   ;;  %v602_v28 = vmov 22  }
  0x1a   :  { %94 = vperm.xlu1 %495, %v651_v2   ;;  %72 = vperm.xlu0 %493, %v651_v2   ;;  %v603_v29 = vmov 24   ;;  %v604_v30 = vmov 25   ;;  %v605_v31 = vmov 27   ;;  %v606_v32 = vmov 28  }
  0x1b   :  { %v607_v33 = vmov 30   ;;  %v608_v34 = vmov 31   ;;  %v40_v36 = vshrl.u32 %v39_v35, 7  ;;  %v46_v37 = vand.u32 127, %v39_v35 }
  0x1d   :  { %v690_v38 = vsub.s32 0, %v40_v36  ;;  %vm49_vm0 = vcmp.eq.s32.totalorder %v40_v36, %v46_v37  ;;  %vm51_vm1 = vcmp.ge.s32.totalorder %v46_v37, 8  ;;  %v693_v41 = vsub.s32 2, %v40_v36 }
  0x1e   :  { %496 = vset.pattern.permute.xlu1 %v581_v6  ;;  %497 = vset.pattern.permute.xlu0 %v582_v7  ;;  %v695_v42 = vsub.s32 1, %v40_v36  ;;  %vm52_vm2 = vmor %vm49_vm0, %vm51_vm1  ;;  %v697_v45 = vsub.s32 3, %v40_v36  ;;  %v702_v51 = vsub.s32 4, %v40_v36  ;;  %v704_v52 = vsub.s32 5, %v40_v36 }
  0x1f   :  { %105 = vperm.xlu1 %496, %v651_v2   ;;  %116 = vperm.xlu0 %497, %v651_v2   ;;  %v67_v40 = vrot.slane %v55_v39, %v690_v38  ;;  %v89_v47 = vrot.slane %v55_v39, %v693_v41  ;;  %v53_v49 = vsel %vm52_vm2, 1e+30, %v578_v3  ;;  %v709_v63 = vsub.s32 6, %v40_v36 }
  0x20   :  { %v78_v48 = vrot.slane %v55_v39, %v695_v42  ;;  %v100_v53 = vrot.slane %v55_v39, %v697_v45  ;;  %v111_v59 = vrot.slane %v55_v39, %v702_v51  ;;  %v122_v60 = vrot.slane %v55_v39, %v704_v52 }
  0x23   :  { %498 = vset.pattern.permute.xlu1 %v583_v8  ;;  %500 = vset.pattern.permute.xlu0 %v584_v9  ;;  %v133_v8 = vrot.slane %v55_v39, %v709_v63 }
  0x24   :  { %127 = vperm.xlu1 %498, %v651_v2   ;;  %149 = vperm.xlu0 %500, %v651_v2  }
  0x28   :  { %499 = vset.pattern.permute.xlu1 %v585_v10  ;;  %503 = vset.pattern.permute.xlu0 %v586_v11  ;;  %v712_v10 = vsub.s32 7, %v40_v36 }
  0x29   :  { %138 = vperm.xlu1 %499, %v651_v2   ;;  %182 = vperm.xlu0 %503, %v651_v2  }
  0x2d   :  { %501 = vset.pattern.permute.xlu1 %v587_v12  ;;  %506 = vset.pattern.permute.xlu0 %v588_v13  ;;  %v56_v12 = vld [vmem:[#allocation2 + $0x8] sm:$0xff] }
  0x2e   :  { %160 = vperm.xlu1 %501, %v651_v2   ;;  %215 = vperm.xlu0 %506, %v651_v2  }
  0x32   :  { %502 = vset.pattern.permute.xlu1 %v589_v14  ;;  %509 = vset.pattern.permute.xlu0 %v590_v15 }
  0x33   :  { %171 = vperm.xlu1 %502, %v651_v2   ;;  %248 = vperm.xlu0 %509, %v651_v2  }
  0x37   :  { %504 = vset.pattern.permute.xlu1 %v591_v16  ;;  %512 = vset.pattern.permute.xlu0 %v592_v17  ;;  %v144_v17 = vrot.slane %v55_v39, %v712_v10 }
  0x38   :  { %193 = vperm.xlu1 %504, %v651_v2   ;;  %281 = vperm.xlu0 %512, %v651_v2  }
  0x3c   :  { %505 = vset.pattern.permute.xlu1 %v593_v18  ;;  %515 = vset.pattern.permute.xlu0 %v594_v19  ;;  %v155_v18 = vrot.slane %v56_v12, %v690_v38 }
  0x3d   :  { %204 = vperm.xlu1 %505, %v651_v2   ;;  %314 = vperm.xlu0 %515, %v651_v2  }
  0x41   :  { %507 = vset.pattern.permute.xlu1 %v595_v20  ;;  %518 = vset.pattern.permute.xlu0 %v596_v21 }
  0x42   :  { %226 = vperm.xlu1 %507, %v651_v2   ;;  %347 = vperm.xlu0 %518, %v651_v2  }
  0x46   :  { %508 = vset.pattern.permute.xlu1 %v597_v22  ;;  %521 = vset.pattern.permute.xlu0 %v598_v23 }
  0x47   :  { %237 = vperm.xlu1 %508, %v651_v2   ;;  %380 = vperm.xlu0 %521, %v651_v2  }
  0x4b   :  { %510 = vset.pattern.permute.xlu1 %v599_v25  ;;  %524 = vset.pattern.permute.xlu0 %v577_v1  ;;  %v166_v25 = vrot.slane %v56_v12, %v695_v42 }
  0x4c   :  { %259 = vperm.xlu1 %510, %v651_v2   ;;  %415 = vperm.xlu0 %524, %v37_v24  }
  0x50   :  { %511 = vset.pattern.permute.xlu1 %v600_v26 }
  0x51   :  { %270 = vperm.xlu1 %511, %v651_v2  }
  0x55   :  { %513 = vset.pattern.permute.xlu1 %v601_v27 }
  0x56   :  { %292 = vperm.xlu1 %513, %v651_v2  }
  0x5a   :  { %514 = vset.pattern.permute.xlu1 %v602_v28 }
  0x5b   :  { %303 = vperm.xlu1 %514, %v651_v2  }
  0x5f   :  { %516 = vset.pattern.permute.xlu1 %v603_v29 }
  0x60   :  { %325 = vperm.xlu1 %516, %v651_v2  }
  0x64   :  { %517 = vset.pattern.permute.xlu1 %v604_v30 }
  0x65   :  { %336 = vperm.xlu1 %517, %v651_v2  }
  0x69   :  { %519 = vset.pattern.permute.xlu1 %v605_v31 }
  0x6a   :  { %358 = vperm.xlu1 %519, %v651_v2  }
  0x6e   :  { %520 = vset.pattern.permute.xlu1 %v606_v32  ;;  %v177_v32 = vrot.slane %v56_v12, %v693_v41 }
  0x6f   :  { %369 = vperm.xlu1 %520, %v651_v2  }
  0x73   :  { %522 = vset.pattern.permute.xlu1 %v607_v33  ;;  %v188_v33 = vrot.slane %v56_v12, %v697_v45 }
  0x74   :  { %391 = vperm.xlu1 %522, %v651_v2  }
  0x78   :  { %523 = vset.pattern.permute.xlu1 %v608_v34 }
  0x79   :  { %402 = vperm.xlu1 %523, %v651_v2  }
  0x94   :  { %v84_v43 = vpop.permute.xlu1 %83  ;;  %v62_v44 = vpop.permute.xlu0 %61 }
  0x95   :  { %v68_v46 = vsub.f32 %v62_v44, %v67_v40  ;;  %v90_v56 = vsub.f32 %v84_v43, %v89_v47  ;;  %v199_v43 = vrot.slane %v56_v12, %v702_v51 }
  0x97   :  { %v69_v50 = vand.u32 2147483647, %v68_v46  ;;  %v91_v0 = vand.u32 2147483647, %v90_v56 }
  0x99   :  { %v95_v54 = vpop.permute.xlu1 %94  ;;  %v73_v55 = vpop.permute.xlu0 %72  ;;  %v70_v57 = vadd.f32 %v69_v50, %v53_v49 }
  0x9a   :  { %v79_v58 = vsub.f32 %v73_v55, %v78_v48  ;;  %v101_v61 = vsub.f32 %v95_v54, %v100_v53  ;;  %v210_v53 = vrot.slane %v56_v12, %v704_v52  ;;  %v221_v54 = vrot.slane %v56_v12, %v709_v63 }
  0x9c   :  { %v80_v62 = vand.u32 2147483647, %v79_v58  ;;  %v102_v6 = vand.u32 2147483647, %v101_v61  ;;  %v232_v61 = vrot.slane %v56_v12, %v712_v10 }
  0x9e   :  { %v81_v1 = vadd.f32 %v80_v62, %v70_v57  ;;  %v106_v2 = vpop.permute.xlu1 %105  ;;  %v117_v3 = vpop.permute.xlu0 %116 }
  0x9f   :  { %v112_v4 = vsub.f32 %v106_v2, %v111_v59  ;;  %v123_v5 = vsub.f32 %v117_v3, %v122_v60 }
  0xa0   :  { %v92_v7 = vadd.f32 %v91_v0, %v81_v1  ;;  %v57_v1 = vld [vmem:[#allocation2 + $0x10] sm:$0xff] }
  0xa1   :  { %v113_v9 = vand.u32 2147483647, %v112_v4  ;;  %v124_v13 = vand.u32 2147483647, %v123_v5 }
  0xa2   :  { %v103_v11 = vadd.f32 %v102_v6, %v92_v7  ;;  %v243_v6 = vrot.slane %v57_v1, %v690_v38  ;;  %v254_v7 = vrot.slane %v57_v1, %v695_v42 }
  0xa3   :  { %v128_v14 = vpop.permute.xlu1 %127  ;;  %v150_v19 = vpop.permute.xlu0 %149 }
  0xa4   :  { %v114_v15 = vadd.f32 %v113_v9, %v103_v11  ;;  %v134_v16 = vsub.f32 %v128_v14, %v133_v8  ;;  %v156_v24 = vsub.f32 %v150_v19, %v155_v18 }
  0xa6   :  { %v125_v20 = vadd.f32 %v124_v13, %v114_v15  ;;  %v135_v21 = vand.u32 2147483647, %v134_v16  ;;  %v157_v29 = vand.u32 2147483647, %v156_v24  ;;  %v265_v16 = vrot.slane %v57_v1, %v693_v41 }
  0xa8   :  { %v139_v22 = vpop.permute.xlu1 %138  ;;  %v136_v26 = vadd.f32 %v135_v21, %v125_v20  ;;  %v183_v34 = vpop.permute.xlu0 %182 }
  0xa9   :  { %v145_v23 = vsub.f32 %v139_v22, %v144_v17  ;;  %v189_v40 = vsub.f32 %v183_v34, %v188_v33  ;;  %v276_v22 = vrot.slane %v57_v1, %v697_v45 }
  0xab   :  { %v146_v27 = vand.u32 2147483647, %v145_v23  ;;  %v190_v48 = vand.u32 2147483647, %v189_v40  ;;  %v287_v23 = vrot.slane %v57_v1, %v702_v51 }
  0xad   :  { %v147_v28 = vadd.f32 %v146_v27, %v136_v26  ;;  %v161_v30 = vpop.permute.xlu1 %160  ;;  %v216_v55 = vpop.permute.xlu0 %215 }
  0xae   :  { %v167_v31 = vsub.f32 %v161_v30, %v166_v25  ;;  %v222_v60 = vsub.f32 %v216_v55, %v221_v54  ;;  %v298_v30 = vrot.slane %v57_v1, %v704_v52 }
  0xaf   :  { %v158_v35 = vadd.f32 %v157_v29, %v147_v28 }
  0xb0   :  { %v168_v36 = vand.u32 2147483647, %v167_v31  ;;  %v223_v3 = vand.u32 2147483647, %v222_v60 }
  0xb2   :  { %v172_v37 = vpop.permute.xlu1 %171  ;;  %v169_v44 = vadd.f32 %v168_v36, %v158_v35  ;;  %v249_v8 = vpop.permute.xlu0 %248 }
  0xb3   :  { %v178_v39 = vsub.f32 %v172_v37, %v177_v32  ;;  %v255_v15 = vsub.f32 %v249_v8, %v254_v7  ;;  %v309_v37 = vrot.slane %v57_v1, %v709_v63 }
  0xb5   :  { %v179_v46 = vand.u32 2147483647, %v178_v39  ;;  %v256_v19 = vand.u32 2147483647, %v255_v15  ;;  %v320_v39 = vrot.slane %v57_v1, %v712_v10 }
  0xb7   :  { %v180_v47 = vadd.f32 %v179_v46, %v169_v44  ;;  %v194_v49 = vpop.permute.xlu1 %193  ;;  %v282_v24 = vpop.permute.xlu0 %281  ;;  %v58_v46 = vld [vmem:[#allocation2 + $0x18] sm:$0xff] }
  0xb8   :  { %v200_v50 = vsub.f32 %v194_v49, %v199_v43  ;;  %v288_v29 = vsub.f32 %v282_v24, %v287_v23  ;;  %v353_v60 = vrot.slane %v58_v46, %v693_v41  ;;  %v408_v23 = vrot.slane %v58_v46, %v712_v10 }
  0xb9   :  { %v191_v56 = vadd.f32 %v190_v48, %v180_v47 }
  0xba   :  { %v201_v57 = vand.u32 2147483647, %v200_v50  ;;  %v289_v34 = vand.u32 2147483647, %v288_v29  ;;  %v331_v50 = vrot.slane %v58_v46, %v690_v38 }
  0xbc   :  { %v205_v58 = vpop.permute.xlu1 %204  ;;  %v202_v62 = vadd.f32 %v201_v57, %v191_v56  ;;  %v315_v40 = vpop.permute.xlu0 %314 }
  0xbd   :  { %v211_v59 = vsub.f32 %v205_v58, %v210_v53  ;;  %v321_v49 = vsub.f32 %v315_v40, %v320_v39  ;;  %v436_v40 = vld [vmem:[#allocation5] sm:$0x1] }
  0xbf   :  { %v212_v0 = vand.u32 2147483647, %v211_v59  ;;  %v322_v56 = vand.u32 2147483647, %v321_v49  ;;  %v342_v59 = vrot.slane %v58_v46, %v695_v42  ;;  %v386_v42 = vrot.slane %v58_v46, %v704_v52 }
  0xc1   :  { %v213_v2 = vadd.f32 %v212_v0, %v202_v62  ;;  %v227_v4 = vpop.permute.xlu1 %226 }
  0xc2   :  { %v233_v5 = vsub.f32 %v227_v4, %v232_v61  ;;  %v348_v61 = vpop.permute.xlu0 %347  ;;  %v364_v4 = vrot.slane %v58_v46, %v697_v45 }
  0xc3   :  { %v224_v9 = vadd.f32 %v223_v3, %v213_v2  ;;  %v354_v3 = vsub.f32 %v348_v61, %v353_v60 }
  0xc4   :  { %v234_v11 = vand.u32 2147483647, %v233_v5 }
  0xc5   :  { %v355_v7 = vand.u32 2147483647, %v354_v3 }
  0xc6   :  { %v238_v13 = vpop.permute.xlu1 %237  ;;  %v235_v12 = vadd.f32 %v234_v11, %v224_v9  ;;  %v375_v11 = vrot.slane %v58_v46, %v702_v51 }
  0xc7   :  { %v244_v14 = vsub.f32 %v238_v13, %v243_v6  ;;  %v381_v13 = vpop.permute.xlu0 %380 }
  0xc9   :  { %v245_v17 = vand.u32 2147483647, %v244_v14 }
  0xcb   :  { %v246_v18 = vadd.f32 %v245_v17, %v235_v12  ;;  %v260_v20 = vpop.permute.xlu1 %259  ;;  %v387_v12 = vsub.f32 %v381_v13, %v386_v42  ;;  %v397_v17 = vrot.slane %v58_v46, %v709_v63  ;;  %v416_v29 = vpop.permute.xlu0 %415 }
  0xcc   :  { %v266_v21 = vsub.f32 %v260_v20, %v265_v16 }
  0xcd   :  { %v257_v25 = vadd.f32 %v256_v19, %v246_v18  ;;  %v388_v20 = vand.u32 2147483647, %v387_v12 }
  0xce   :  { %v267_v26 = vand.u32 2147483647, %v266_v21 }
  0xd0   :  { %v271_v27 = vpop.permute.xlu1 %270  ;;  %v268_v31 = vadd.f32 %v267_v26, %v257_v25 }
  0xd1   :  { %v277_v28 = vsub.f32 %v271_v27, %v276_v22 }
  0xd3   :  { %v278_v32 = vand.u32 2147483647, %v277_v28  ;;  %v454_v28 = vld [vmem:[%s757_s3] ss:$0 sm:$0xff]  ;;  %s547_s3 = scalar_lea.vmem %s446_s7, 16 }
  0xd4   :  { %p548_p8 = scmp.ne.s32.totalorder %s446_s7, %s547_s3  ;;  %p553_p10 = scmp.lt.s32.totalorder %s551_s8, %s547_s3 }
  0xd5   :  { %v279_v33 = vadd.f32 %v278_v32, %v268_v31  ;;  %v293_v35 = vpop.permute.xlu1 %292 }
  0xd6   :  { %v299_v36 = vsub.f32 %v293_v35, %v298_v30  ;;  %p554_p11 = por %p553_p10, %p552_p9 }
  0xd7   :  { %v290_v43 = vadd.f32 %v289_v34, %v279_v33 }
  0xd8   :  { %v300_v44 = vand.u32 2147483647, %v299_v36  ;;  %p555_p12 = pnand %p554_p11, %p548_p8 }
  0xda   :  { %v304_v47 = vpop.permute.xlu1 %303  ;;  %v301_v53 = vadd.f32 %v300_v44, %v290_v43 }
  0xdb   :  { %v310_v48 = vsub.f32 %v304_v47, %v309_v37 }
  0xdd   :  { %v311_v54 = vand.u32 2147483647, %v310_v48 }
  0xdf   :  { %v312_v55 = vadd.f32 %v311_v54, %v301_v53  ;;  %v326_v57 = vpop.permute.xlu1 %325 }
  0xe0   :  { %v332_v58 = vsub.f32 %v326_v57, %v331_v50 }
  0xe1   :  { %v323_v62 = vadd.f32 %v322_v56, %v312_v55 }
  0xe2   :  { %v333_v0 = vand.u32 2147483647, %v332_v58 }
  0xe4   :  { %v337_v1 = vpop.permute.xlu1 %336  ;;  %v334_v5 = vadd.f32 %v333_v0, %v323_v62 }
  0xe5   :  { %v343_v2 = vsub.f32 %v337_v1, %v342_v59 }
  0xe7   :  { %v344_v38 = vand.u32 2147483647, %v343_v2 }
  0xe9   :  { %v345_v6 = vadd.f32 %v344_v38, %v334_v5  ;;  %v359_v8 = vpop.permute.xlu1 %358 }
  0xea   :  { %v365_v9 = vsub.f32 %v359_v8, %v364_v4 }
  0xeb   :  { %v356_v41 = vadd.f32 %v355_v7, %v345_v6 }
  0xec   :  { %v366_v14 = vand.u32 2147483647, %v365_v9 }
  0xee   :  { %v370_v15 = vpop.permute.xlu1 %369  ;;  %v367_v18 = vadd.f32 %v366_v14, %v356_v41 }
  0xef   :  { %v376_v16 = vsub.f32 %v370_v15, %v375_v11 }
  0xf1   :  { %v377_v45 = vand.u32 2147483647, %v376_v16 }
  0xf3   :  { %v378_v19 = vadd.f32 %v377_v45, %v367_v18  ;;  %v392_v21 = vpop.permute.xlu1 %391 }
  0xf4   :  { %v398_v22 = vsub.f32 %v392_v21, %v397_v17 }
  0xf5   :  { %v389_v24 = vadd.f32 %v388_v20, %v378_v19 }
  0xf6   :  { %v399_v51 = vand.u32 2147483647, %v398_v22 }
  0xf8   :  { %v403_v25 = vpop.permute.xlu1 %402  ;;  %v400_v26 = vadd.f32 %v399_v51, %v389_v24 }
  0xf9   :  { %v409_v52 = vsub.f32 %v403_v25, %v408_v23 }
  0xfb   :  { %v410_v27 = vand.u32 2147483647, %v409_v52 }
  0xfd   :  { %v411_v63 = vadd.f32 %v410_v27, %v400_v26 }
  0xff   :  { %v426_v30 = vsub.f32 %v454_v28, %v411_v63  ;;  %v418_v31 = vsub.f32 %v416_v29, %v411_v63 }
 0x101   :  { %v427_v32 = vmax.f32 %v426_v30, 0.0  ;;  %v419_v33 = vmax.f32 %v418_v31, 0.0 }
 0x103   :  { %v428_v34 = vadd.f32 %v427_v32, %v419_v33 }
 0x105   :  { %v429_v35 = vrot.slane %v428_v34, 4 }
 0x107   :  { %v430_v36 = vadd.f32 %v429_v35, %v428_v34 }
 0x109   :  { %v431_v10 = vrot.slane %v430_v36, 2 }
 0x10b   :  { %v432_v37 = vadd.f32 %v431_v10, %v430_v36 }
 0x10d   :  { %v433_v39 = vrot.slane %v432_v37, 1 }
 0x10f   :  { %v434_v43 = vadd.f32 %v433_v39, %v432_v37 }
 0x111   :  { %v437_v44 = vadd.f32 %v436_v40, %v434_v43 }
 0x113   :  { %438 = vst [vmem:[#allocation5] sm:$0x1] %v437_v44 }
 0x114   :  { %558 = shalt.err (!%p555_p12)
}
 0x115   :  { %s559_s11 = scalar_lea.hbm %s758_s4, 16 }
 0x116   :  { %p560_p13 = scmp.ne.s32.totalorder %s758_s4, %s559_s11  ;;  %p563_p0 = scmp.lt.u32.totalorder %s559_s11, %s758_s4 }
 0x118   :  { %p565_p1 = pnand %p563_p0, %p560_p13 }
 0x11a   :  { %568 = shalt.err (!%p565_p1)
}
 0x11b   :  { %448 = dma.vmem_to_hbm [thread:$0]  %s446_s7, 16, %s758_s4, [#allocation4]  }
 0x11c   :  { %571 = dma.done.wait [#allocation4], 16  }
 0x11d   :  { %572 = vsyncadd [#allocation4], 4294967280 }
 0x11e   :  { %452 = vsyncpa [#allocation3], 1 }
 0x11f   :  { %453 = vsyncpa [#allocation4], 1 }

</bundles_post_ra>
